<compile_context>
chip_gen: v7x
topology: tpu7x:2x2x1
jax: 0.10.0
libtpu: 0.0.40
codegen_flags: <defaults>
</compile_context>

<pallas_src>
import math

import jax
import jax.numpy as jnp
import numpy as np
from jax import lax
from jax.experimental import pallas as pl
from jax.experimental.pallas import tpu as pltpu


def _round_up(n, m):
    return ((n + m - 1) // m) * m


# ----------------------------------------------------------------------------
# One-time parameter packing (runs once at init, NOT in the forward path).
# ----------------------------------------------------------------------------
def pack_lstm_params(params):
    """Pack all LSTM + Linear weights into one lane-padded f32 slab.

    Layout (rows, 4*Hp), row offsets 8-aligned:
      [R_WIN : R_WIN+I)   W_ih^T,   per-gate lane-padded, i/f/o blocks * 0.5
      [R_B   : R_B+1)     b_ih+b_hh, lane-padded,          i/f/o blocks * 0.5
      [R_WHH : R_WHH+H)   W_hh^T,   per-gate lane-padded, i/f/o blocks * 0.5
      [R_WOUT: R_WOUT+H)  W_out^T   in columns [0, O)
      [R_BOUT: R_BOUT+1)  b_out     in columns [0, O)
    """
    w_ih, w_hh, b_ih, b_hh, w_out, b_out = (
        params["w_ih"], params["w_hh"], params["b_ih"],
        params["b_hh"], params["w_out"], params["b_out"])

    H = w_hh.shape[1]
    I = w_ih.shape[1]
    O = w_out.shape[0]
    Hp = _round_up(H, 128)            # per-gate lane padding to a full vreg group
    G = 4 * Hp

    def pad_gates(a):
        # a: (4H, ...) -> (4Hp, ...), zero-padding each gate block from H to Hp.
        blocks = a.reshape((4, H) + a.shape[1:])
        pad = [(0, 0), (0, Hp - H)] + [(0, 0)] * (a.ndim - 1)
        return jnp.pad(blocks, pad).reshape((4 * Hp,) + a.shape[1:])

    # 0.5 pre-scale on i/f/o gates enables the single-tanh gate evaluation:
    #   sigmoid(z) = 0.5 * (tanh(z/2) + 1).  The g gate stays unscaled.
    gate_scale = jnp.repeat(jnp.array([0.5, 0.5, 1.0, 0.5], jnp.float32), Hp)  # (4Hp,)

    w_in_rows = (pad_gates(w_ih).astype(jnp.float32) * gate_scale[:, None]).T      # (I, 4Hp)
    bias_row = (pad_gates((b_ih + b_hh)).astype(jnp.float32) * gate_scale)[None]   # (1, 4Hp)
    whh_rows = (pad_gates(w_hh).astype(jnp.float32) * gate_scale[:, None]).T       # (H, 4Hp)
    wout_rows = jnp.pad(w_out.T.astype(jnp.float32), ((0, 0), (0, G - O)))         # (H, 4Hp)
    bout_row = jnp.pad(b_out.reshape(1, O).astype(jnp.float32), ((0, 0), (0, G - O)))

    r_win = 0
    r_b = _round_up(r_win + I, 8)
    r_whh = _round_up(r_b + 1, 8)
    r_wout = _round_up(r_whh + H, 8)
    r_bout = _round_up(r_wout + H, 8)
    n_rows = _round_up(r_bout + 1, 8)

    slab = jnp.zeros((n_rows, G), jnp.float32)
    slab = slab.at[r_win:r_win + I].set(w_in_rows)
    slab = slab.at[r_b:r_b + 1].set(bias_row)
    slab = slab.at[r_whh:r_whh + H].set(whh_rows)
    slab = slab.at[r_wout:r_wout + H].set(wout_rows)
    slab = slab.at[r_bout:r_bout + 1].set(bout_row)

    return {
        "slab": slab,
        "dims": (I, H, Hp, O),
        "offsets": (r_win, r_b, r_whh, r_wout, r_bout),
    }


# ----------------------------------------------------------------------------
# Kernel
# ----------------------------------------------------------------------------
def _make_lstm_kernel(S, I, H, Hp, O, offsets):
    r_win, r_b, r_whh, r_wout, r_bout = offsets
    G = 4 * Hp

    def kernel(x_ref, w_ref, out_ref, xg_ref):
        """x_ref: (S, I)   w_ref: (rows, 4Hp) packed slab
           out_ref: (1, O) xg_ref: (S, 4Hp) VMEM scratch for the input projection."""
        # Static slab slices (start/size are Python ints -> cheap one-time loads).
        w_in = w_ref[pl.ds(r_win, I), :]                     # (I, 4Hp), pre-scaled
        bias = w_ref[pl.ds(r_b, 1), :]                       # (1, 4Hp), pre-scaled
        whh = w_ref[pl.ds(r_whh, H), :]                      # (H, 4Hp), loop-invariant
        w_out = w_ref[pl.ds(r_wout, H), pl.ds(0, O)]         # (H, O)
        b_out = w_ref[pl.ds(r_bout, 1), pl.ds(0, O)]         # (1, O)

        # Whole-sequence input projection (one MXU call) + fused bias, parked in VMEM.
        xg = jnp.dot(x_ref[...], w_in, preferred_element_type=jnp.float32) + bias
        xg_ref[...] = xg

        # Stateless LSTM: h_0 = c_0 = 0; padded lanes provably stay 0
        # (pre-activation 0 -> i=f=o=0.5, g=0 -> c_pad, h_pad stay 0), and they
        # never feed back anyway since both dots below use h[:, :H].
        h = jnp.zeros((1, Hp), jnp.float32)
        c = jnp.zeros((1, Hp), jnp.float32)

        # Statically unrolled serial recurrence; h/c live in vregs.
        for t in range(S):
            gates = xg_ref[pl.ds(t, 1), :] + jnp.dot(
                h[:, :H], whh, preferred_element_type=jnp.float32)     # (1, 4Hp)
            # Single EUP tanh for all four gates (i/f/o pre-scaled by 0.5).
            tg = jnp.tanh(gates)
            i_g = 0.5 * (tg[:, 0 * Hp:1 * Hp] + 1.0)
            f_g = 0.5 * (tg[:, 1 * Hp:2 * Hp] + 1.0)
            g_g = tg[:, 2 * Hp:3 * Hp]
            o_g = 0.5 * (tg[:, 3 * Hp:4 * Hp] + 1.0)
            c = f_g * c + i_g * g_g
            h = o_g * jnp.tanh(c)

        # Output linear layer on the final hidden state.
        out_ref[...] = (jnp.dot(h[:, :H], w_out,
                                preferred_element_type=jnp.float32) + b_out)

    return kernel


def lstm_forward(x, packed):
    """x: (1, S, I) float32 -> (1, O) float32.  `packed` from pack_lstm_params()."""
    I, H, Hp, O = packed["dims"]
    offsets = packed["offsets"]
    _, S, _ = x.shape

    x2d = x.reshape(S, I).astype(jnp.float32)     # metadata-only per-call op

    kernel = _make_lstm_kernel(S, I, H, Hp, O, offsets)
    vmem = pl.BlockSpec(memory_space=pltpu.MemorySpace.VMEM)
    out = pl.pallas_call(
        kernel,
        out_shape=jax.ShapeDtypeStruct((1, O), jnp.float32),
        in_specs=[vmem, vmem],
        out_specs=vmem,
        scratch_shapes=[pltpu.VMEM((S, 4 * Hp), jnp.float32)],
    )(x2d, packed["slab"])
    return out


# ----------------------------------------------------------------------------
# Pure-JAX reference (torch.nn.LSTM + Linear semantics) and init
# ----------------------------------------------------------------------------
def lstm_reference(x, params):
    w_ih, w_hh, b_ih, b_hh, w_out, b_out = (
        params["w_ih"], params["w_hh"], params["b_ih"],
        params["b_hh"], params["w_out"], params["b_out"])
    H = w_hh.shape[1]
    x2d = x.reshape(x.shape[1], x.shape[2])

    def cell(carry, x_t):
        h, c = carry
        gates = x_t @ w_ih.T + b_ih + h @ w_hh.T + b_hh
        i = jax.nn.sigmoid(gates[0:H])
        f = jax.nn.sigmoid(gates[H:2 * H])
        g = jnp.tanh(gates[2 * H:3 * H])
        o = jax.nn.sigmoid(gates[3 * H:4 * H])
        c_new = f * c + i * g
        h_new = o * jnp.tanh(c_new)
        return (h_new, c_new), h_new

    (h_last, _), _ = lax.scan(cell, (jnp.zeros(H), jnp.zeros(H)), x2d)
    return (h_last @ w_out.T + b_out).reshape(1, -1)


def init_params(key, input_dim, hidden_dim, output_dim):
    """Deterministic init mimicking PyTorch's uniform(-1/sqrt(H), 1/sqrt(H))."""
    ks = jax.random.split(key, 6)
    k_lstm = 1.0 / math.sqrt(hidden_dim)
    k_lin = 1.0 / math.sqrt(hidden_dim)
    u = lambda k, shape, lim: jax.random.uniform(
        k, shape, jnp.float32, minval=-lim, maxval=lim)
    return {
        "w_ih": u(ks[0], (4 * hidden_dim, input_dim), k_lstm),
        "w_hh": u(ks[1], (4 * hidden_dim, hidden_dim), k_lstm),
        "b_ih": u(ks[2], (4 * hidden_dim,), k_lstm),
        "b_hh": u(ks[3], (4 * hidden_dim,), k_lstm),
        "w_out": u(ks[4], (output_dim, hidden_dim), k_lin),
        "b_out": u(ks[5], (output_dim,), k_lin),
    }


if __name__ == "__main__":
    input_dim, hidden_dim, output_dim = 4, 32, 1
    seq_len, batch = 8, 1

    key = jax.random.PRNGKey(0)
    k_x, k_p = jax.random.split(key)
    x = jax.random.normal(k_x, (batch, seq_len, input_dim), jnp.float32)
    params = init_params(k_p, input_dim, hidden_dim, output_dim)

    packed = pack_lstm_params(params)          # one-time packing, outside forward path
    packed["slab"] = jax.block_until_ready(packed["slab"])

    out = lstm_forward(x, packed)
    out = jax.block_until_ready(out)

    ref = lstm_reference(x, params)
    np.testing.assert_allclose(np.asarray(out), np.asarray(ref),
                               rtol=1e-5, atol=1e-5)
    print("KERNEL_OK")
</pallas_src>

<mosaic_0001>
module attributes {stable_mosaic.version = 11 : i64} {
  func.func @kernel(%arg0: memref<8x4xf32, #tpu.memory_space<vmem>>, %arg1: memref<88x512xf32, #tpu.memory_space<vmem>>, %arg2: memref<1x1xf32, #tpu.memory_space<vmem>>, %arg3: memref<8x512xf32, #tpu.memory_space<vmem>>) attributes {dimension_semantics = [], scalar_prefetch = 0 : i64, scratch_operands = 1 : i64, tpu.core_type = #tpu.core_type<tc>} {
    %c0 = arith.constant 0 : index
    %c0_0 = arith.constant 0 : index
    %0 = vector.load %arg1[%c0, %c0_0] : memref<88x512xf32, #tpu.memory_space<vmem>>, vector<4x512xf32>
    %c8 = arith.constant 8 : index
    %c0_1 = arith.constant 0 : index
    %1 = vector.load %arg1[%c8, %c0_1] : memref<88x512xf32, #tpu.memory_space<vmem>>, vector<1x512xf32>
    %c16 = arith.constant 16 : index
    %c0_2 = arith.constant 0 : index
    %2 = vector.load %arg1[%c16, %c0_2] : memref<88x512xf32, #tpu.memory_space<vmem>>, vector<32x512xf32>
    %c48 = arith.constant 48 : index
    %c0_3 = arith.constant 0 : index
    %3 = vector.load %arg1[%c48, %c0_3] : memref<88x512xf32, #tpu.memory_space<vmem>>, vector<32x1xf32>
    %c80 = arith.constant 80 : index
    %c0_4 = arith.constant 0 : index
    %4 = vector.load %arg1[%c80, %c0_4] : memref<88x512xf32, #tpu.memory_space<vmem>>, vector<1x1xf32>
    %c0_5 = arith.constant 0 : index
    %c0_6 = arith.constant 0 : index
    %5 = vector.load %arg0[%c0_5, %c0_6] : memref<8x4xf32, #tpu.memory_space<vmem>>, vector<8x4xf32>
    %cst = arith.constant dense<0.000000e+00> : vector<8x512xf32>
    %6 = tpu.matmul %5, %0, %cst {dimension_numbers = #tpu.dot_dimension_numbers<[1], [0], [0], [1], [0, 0, 1, 1], [], []>} : vector<8x4xf32>, vector<4x512xf32>, vector<8x512xf32> -> vector<8x512xf32>
    %7 = vector.broadcast %1 : vector<1x512xf32> to vector<8x512xf32>
    %8 = arith.addf %6, %7 : vector<8x512xf32>
    %c0_7 = arith.constant 0 : index
    %c0_8 = arith.constant 0 : index
    %9 = vector.load %arg3[%c0_7, %c0_8] : memref<8x512xf32, #tpu.memory_space<vmem>>, vector<8x512xf32>
    tpu.vector_store %arg3[%c0_7, %c0_8], %8 {strides = array<i32>} : memref<8x512xf32, #tpu.memory_space<vmem>>, vector<8x512xf32>,
    %cst_9 = arith.constant 0.000000e+00 : f32
    %10 = vector.broadcast %cst_9 : f32 to vector<1x128xf32>
    %cst_10 = arith.constant 0.000000e+00 : f32
    %11 = vector.broadcast %cst_10 : f32 to vector<1x128xf32>
    %c0_11 = arith.constant 0 : index
    %c0_12 = arith.constant 0 : index
    %12 = vector.load %arg3[%c0_11, %c0_12] : memref<8x512xf32, #tpu.memory_space<vmem>>, vector<1x512xf32>
    %13 = vector.extract_strided_slice %10 {offsets = [0, 0], sizes = [1, 32], strides = [1, 1]} : vector<1x128xf32> to vector<1x32xf32>
    %cst_13 = arith.constant dense<0.000000e+00> : vector<1x512xf32>
    %14 = tpu.matmul %13, %2, %cst_13 {dimension_numbers = #tpu.dot_dimension_numbers<[1], [0], [0], [1], [0, 0, 1, 1], [], []>} : vector<1x32xf32>, vector<32x512xf32>, vector<1x512xf32> -> vector<1x512xf32>
    %15 = arith.addf %12, %14 : vector<1x512xf32>
    %16 = math.tanh %15 : vector<1x512xf32>
    %17 = vector.extract_strided_slice %16 {offsets = [0, 0], sizes = [1, 128], strides = [1, 1]} : vector<1x512xf32> to vector<1x128xf32>
    %cst_14 = arith.constant 1.000000e+00 : f32
    %18 = vector.broadcast %cst_14 : f32 to vector<1x128xf32>
    %19 = arith.addf %17, %18 : vector<1x128xf32>
    %cst_15 = arith.constant 5.000000e-01 : f32
    %20 = vector.broadcast %cst_15 : f32 to vector<1x128xf32>
    %21 = arith.mulf %20, %19 : vector<1x128xf32>
    %22 = vector.extract_strided_slice %16 {offsets = [0, 128], sizes = [1, 128], strides = [1, 1]} : vector<1x512xf32> to vector<1x128xf32>
    %cst_16 = arith.constant 1.000000e+00 : f32
    %23 = vector.broadcast %cst_16 : f32 to vector<1x128xf32>
    %24 = arith.addf %22, %23 : vector<1x128xf32>
    %cst_17 = arith.constant 5.000000e-01 : f32
    %25 = vector.broadcast %cst_17 : f32 to vector<1x128xf32>
    %26 = arith.mulf %25, %24 : vector<1x128xf32>
    %27 = vector.extract_strided_slice %16 {offsets = [0, 256], sizes = [1, 128], strides = [1, 1]} : vector<1x512xf32> to vector<1x128xf32>
    %28 = vector.extract_strided_slice %16 {offsets = [0, 384], sizes = [1, 128], strides = [1, 1]} : vector<1x512xf32> to vector<1x128xf32>
    %cst_18 = arith.constant 1.000000e+00 : f32
    %29 = vector.broadcast %cst_18 : f32 to vector<1x128xf32>
    %30 = arith.addf %28, %29 : vector<1x128xf32>
    %cst_19 = arith.constant 5.000000e-01 : f32
    %31 = vector.broadcast %cst_19 : f32 to vector<1x128xf32>
    %32 = arith.mulf %31, %30 : vector<1x128xf32>
    %33 = arith.mulf %26, %11 : vector<1x128xf32>
    %34 = arith.mulf %21, %27 : vector<1x128xf32>
    %35 = arith.addf %33, %34 : vector<1x128xf32>
    %36 = math.tanh %35 : vector<1x128xf32>
    %37 = arith.mulf %32, %36 : vector<1x128xf32>
    %c1 = arith.constant 1 : index
    %c0_20 = arith.constant 0 : index
    %38 = vector.load %arg3[%c1, %c0_20] : memref<8x512xf32, #tpu.memory_space<vmem>>, vector<1x512xf32>
    %39 = vector.extract_strided_slice %37 {offsets = [0, 0], sizes = [1, 32], strides = [1, 1]} : vector<1x128xf32> to vector<1x32xf32>
    %cst_21 = arith.constant dense<0.000000e+00> : vector<1x512xf32>
    %40 = tpu.matmul %39, %2, %cst_21 {dimension_numbers = #tpu.dot_dimension_numbers<[1], [0], [0], [1], [0, 0, 1, 1], [], []>} : vector<1x32xf32>, vector<32x512xf32>, vector<1x512xf32> -> vector<1x512xf32>
    %41 = arith.addf %38, %40 : vector<1x512xf32>
    %42 = math.tanh %41 : vector<1x512xf32>
    %43 = vector.extract_strided_slice %42 {offsets = [0, 0], sizes = [1, 128], strides = [1, 1]} : vector<1x512xf32> to vector<1x128xf32>
    %cst_22 = arith.constant 1.000000e+00 : f32
    %44 = vector.broadcast %cst_22 : f32 to vector<1x128xf32>
    %45 = arith.addf %43, %44 : vector<1x128xf32>
    %cst_23 = arith.constant 5.000000e-01 : f32
    %46 = vector.broadcast %cst_23 : f32 to vector<1x128xf32>
    %47 = arith.mulf %46, %45 : vector<1x128xf32>
    %48 = vector.extract_strided_slice %42 {offsets = [0, 128], sizes = [1, 128], strides = [1, 1]} : vector<1x512xf32> to vector<1x128xf32>
    %cst_24 = arith.constant 1.000000e+00 : f32
    %49 = vector.broadcast %cst_24 : f32 to vector<1x128xf32>
    %50 = arith.addf %48, %49 : vector<1x128xf32>
    %cst_25 = arith.constant 5.000000e-01 : f32
    %51 = vector.broadcast %cst_25 : f32 to vector<1x128xf32>
    %52 = arith.mulf %51, %50 : vector<1x128xf32>
    %53 = vector.extract_strided_slice %42 {offsets = [0, 256], sizes = [1, 128], strides = [1, 1]} : vector<1x512xf32> to vector<1x128xf32>
    %54 = vector.extract_strided_slice %42 {offsets = [0, 384], sizes = [1, 128], strides = [1, 1]} : vector<1x512xf32> to vector<1x128xf32>
    %cst_26 = arith.constant 1.000000e+00 : f32
    %55 = vector.broadcast %cst_26 : f32 to vector<1x128xf32>
    %56 = arith.addf %54, %55 : vector<1x128xf32>
    %cst_27 = arith.constant 5.000000e-01 : f32
    %57 = vector.broadcast %cst_27 : f32 to vector<1x128xf32>
    %58 = arith.mulf %57, %56 : vector<1x128xf32>
    %59 = arith.mulf %52, %35 : vector<1x128xf32>
    %60 = arith.mulf %47, %53 : vector<1x128xf32>
    %61 = arith.addf %59, %60 : vector<1x128xf32>
    %62 = math.tanh %61 : vector<1x128xf32>
    %63 = arith.mulf %58, %62 : vector<1x128xf32>
    %c2 = arith.constant 2 : index
    %c0_28 = arith.constant 0 : index
    %64 = vector.load %arg3[%c2, %c0_28] : memref<8x512xf32, #tpu.memory_space<vmem>>, vector<1x512xf32>
    %65 = vector.extract_strided_slice %63 {offsets = [0, 0], sizes = [1, 32], strides = [1, 1]} : vector<1x128xf32> to vector<1x32xf32>
    %cst_29 = arith.constant dense<0.000000e+00> : vector<1x512xf32>
    %66 = tpu.matmul %65, %2, %cst_29 {dimension_numbers = #tpu.dot_dimension_numbers<[1], [0], [0], [1], [0, 0, 1, 1], [], []>} : vector<1x32xf32>, vector<32x512xf32>, vector<1x512xf32> -> vector<1x512xf32>
    %67 = arith.addf %64, %66 : vector<1x512xf32>
    %68 = math.tanh %67 : vector<1x512xf32>
    %69 = vector.extract_strided_slice %68 {offsets = [0, 0], sizes = [1, 128], strides = [1, 1]} : vector<1x512xf32> to vector<1x128xf32>
    %cst_30 = arith.constant 1.000000e+00 : f32
    %70 = vector.broadcast %cst_30 : f32 to vector<1x128xf32>
    %71 = arith.addf %69, %70 : vector<1x128xf32>
    %cst_31 = arith.constant 5.000000e-01 : f32
    %72 = vector.broadcast %cst_31 : f32 to vector<1x128xf32>
    %73 = arith.mulf %72, %71 : vector<1x128xf32>
    %74 = vector.extract_strided_slice %68 {offsets = [0, 128], sizes = [1, 128], strides = [1, 1]} : vector<1x512xf32> to vector<1x128xf32>
    %cst_32 = arith.constant 1.000000e+00 : f32
    %75 = vector.broadcast %cst_32 : f32 to vector<1x128xf32>
    %76 = arith.addf %74, %75 : vector<1x128xf32>
    %cst_33 = arith.constant 5.000000e-01 : f32
    %77 = vector.broadcast %cst_33 : f32 to vector<1x128xf32>
    %78 = arith.mulf %77, %76 : vector<1x128xf32>
    %79 = vector.extract_strided_slice %68 {offsets = [0, 256], sizes = [1, 128], strides = [1, 1]} : vector<1x512xf32> to vector<1x128xf32>
    %80 = vector.extract_strided_slice %68 {offsets = [0, 384], sizes = [1, 128], strides = [1, 1]} : vector<1x512xf32> to vector<1x128xf32>
    %cst_34 = arith.constant 1.000000e+00 : f32
    %81 = vector.broadcast %cst_34 : f32 to vector<1x128xf32>
    %82 = arith.addf %80, %81 : vector<1x128xf32>
    %cst_35 = arith.constant 5.000000e-01 : f32
    %83 = vector.broadcast %cst_35 : f32 to vector<1x128xf32>
    %84 = arith.mulf %83, %82 : vector<1x128xf32>
    %85 = arith.mulf %78, %61 : vector<1x128xf32>
    %86 = arith.mulf %73, %79 : vector<1x128xf32>
    %87 = arith.addf %85, %86 : vector<1x128xf32>
    %88 = math.tanh %87 : vector<1x128xf32>
    %89 = arith.mulf %84, %88 : vector<1x128xf32>
    %c3 = arith.constant 3 : index
    %c0_36 = arith.constant 0 : index
    %90 = vector.load %arg3[%c3, %c0_36] : memref<8x512xf32, #tpu.memory_space<vmem>>, vector<1x512xf32>
    %91 = vector.extract_strided_slice %89 {offsets = [0, 0], sizes = [1, 32], strides = [1, 1]} : vector<1x128xf32> to vector<1x32xf32>
    %cst_37 = arith.constant dense<0.000000e+00> : vector<1x512xf32>
    %92 = tpu.matmul %91, %2, %cst_37 {dimension_numbers = #tpu.dot_dimension_numbers<[1], [0], [0], [1], [0, 0, 1, 1], [], []>} : vector<1x32xf32>, vector<32x512xf32>, vector<1x512xf32> -> vector<1x512xf32>
    %93 = arith.addf %90, %92 : vector<1x512xf32>
    %94 = math.tanh %93 : vector<1x512xf32>
    %95 = vector.extract_strided_slice %94 {offsets = [0, 0], sizes = [1, 128], strides = [1, 1]} : vector<1x512xf32> to vector<1x128xf32>
    %cst_38 = arith.constant 1.000000e+00 : f32
    %96 = vector.broadcast %cst_38 : f32 to vector<1x128xf32>
    %97 = arith.addf %95, %96 : vector<1x128xf32>
    %cst_39 = arith.constant 5.000000e-01 : f32
    %98 = vector.broadcast %cst_39 : f32 to vector<1x128xf32>
    %99 = arith.mulf %98, %97 : vector<1x128xf32>
    %100 = vector.extract_strided_slice %94 {offsets = [0, 128], sizes = [1, 128], strides = [1, 1]} : vector<1x512xf32> to vector<1x128xf32>
    %cst_40 = arith.constant 1.000000e+00 : f32
    %101 = vector.broadcast %cst_40 : f32 to vector<1x128xf32>
    %102 = arith.addf %100, %101 : vector<1x128xf32>
    %cst_41 = arith.constant 5.000000e-01 : f32
    %103 = vector.broadcast %cst_41 : f32 to vector<1x128xf32>
    %104 = arith.mulf %103, %102 : vector<1x128xf32>
    %105 = vector.extract_strided_slice %94 {offsets = [0, 256], sizes = [1, 128], strides = [1, 1]} : vector<1x512xf32> to vector<1x128xf32>
    %106 = vector.extract_strided_slice %94 {offsets = [0, 384], sizes = [1, 128], strides = [1, 1]} : vector<1x512xf32> to vector<1x128xf32>
    %cst_42 = arith.constant 1.000000e+00 : f32
    %107 = vector.broadcast %cst_42 : f32 to vector<1x128xf32>
    %108 = arith.addf %106, %107 : vector<1x128xf32>
    %cst_43 = arith.constant 5.000000e-01 : f32
    %109 = vector.broadcast %cst_43 : f32 to vector<1x128xf32>
    %110 = arith.mulf %109, %108 : vector<1x128xf32>
    %111 = arith.mulf %104, %87 : vector<1x128xf32>
    %112 = arith.mulf %99, %105 : vector<1x128xf32>
    %113 = arith.addf %111, %112 : vector<1x128xf32>
    %114 = math.tanh %113 : vector<1x128xf32>
    %115 = arith.mulf %110, %114 : vector<1x128xf32>
    %c4 = arith.constant 4 : index
    %c0_44 = arith.constant 0 : index
    %116 = vector.load %arg3[%c4, %c0_44] : memref<8x512xf32, #tpu.memory_space<vmem>>, vector<1x512xf32>
    %117 = vector.extract_strided_slice %115 {offsets = [0, 0], sizes = [1, 32], strides = [1, 1]} : vector<1x128xf32> to vector<1x32xf32>
    %cst_45 = arith.constant dense<0.000000e+00> : vector<1x512xf32>
    %118 = tpu.matmul %117, %2, %cst_45 {dimension_numbers = #tpu.dot_dimension_numbers<[1], [0], [0], [1], [0, 0, 1, 1], [], []>} : vector<1x32xf32>, vector<32x512xf32>, vector<1x512xf32> -> vector<1x512xf32>
    %119 = arith.addf %116, %118 : vector<1x512xf32>
    %120 = math.tanh %119 : vector<1x512xf32>
    %121 = vector.extract_strided_slice %120 {offsets = [0, 0], sizes = [1, 128], strides = [1, 1]} : vector<1x512xf32> to vector<1x128xf32>
    %cst_46 = arith.constant 1.000000e+00 : f32
    %122 = vector.broadcast %cst_46 : f32 to vector<1x128xf32>
    %123 = arith.addf %121, %122 : vector<1x128xf32>
    %cst_47 = arith.constant 5.000000e-01 : f32
    %124 = vector.broadcast %cst_47 : f32 to vector<1x128xf32>
    %125 = arith.mulf %124, %123 : vector<1x128xf32>
    %126 = vector.extract_strided_slice %120 {offsets = [0, 128], sizes = [1, 128], strides = [1, 1]} : vector<1x512xf32> to vector<1x128xf32>
    %cst_48 = arith.constant 1.000000e+00 : f32
    %127 = vector.broadcast %cst_48 : f32 to vector<1x128xf32>
    %128 = arith.addf %126, %127 : vector<1x128xf32>
    %cst_49 = arith.constant 5.000000e-01 : f32
    %129 = vector.broadcast %cst_49 : f32 to vector<1x128xf32>
    %130 = arith.mulf %129, %128 : vector<1x128xf32>
    %131 = vector.extract_strided_slice %120 {offsets = [0, 256], sizes = [1, 128], strides = [1, 1]} : vector<1x512xf32> to vector<1x128xf32>
    %132 = vector.extract_strided_slice %120 {offsets = [0, 384], sizes = [1, 128], strides = [1, 1]} : vector<1x512xf32> to vector<1x128xf32>
    %cst_50 = arith.constant 1.000000e+00 : f32
    %133 = vector.broadcast %cst_50 : f32 to vector<1x128xf32>
    %134 = arith.addf %132, %133 : vector<1x128xf32>
    %cst_51 = arith.constant 5.000000e-01 : f32
    %135 = vector.broadcast %cst_51 : f32 to vector<1x128xf32>
    %136 = arith.mulf %135, %134 : vector<1x128xf32>
    %137 = arith.mulf %130, %113 : vector<1x128xf32>
    %138 = arith.mulf %125, %131 : vector<1x128xf32>
    %139 = arith.addf %137, %138 : vector<1x128xf32>
    %140 = math.tanh %139 : vector<1x128xf32>
    %141 = arith.mulf %136, %140 : vector<1x128xf32>
    %c5 = arith.constant 5 : index
    %c0_52 = arith.constant 0 : index
    %142 = vector.load %arg3[%c5, %c0_52] : memref<8x512xf32, #tpu.memory_space<vmem>>, vector<1x512xf32>
    %143 = vector.extract_strided_slice %141 {offsets = [0, 0], sizes = [1, 32], strides = [1, 1]} : vector<1x128xf32> to vector<1x32xf32>
    %cst_53 = arith.constant dense<0.000000e+00> : vector<1x512xf32>
    %144 = tpu.matmul %143, %2, %cst_53 {dimension_numbers = #tpu.dot_dimension_numbers<[1], [0], [0], [1], [0, 0, 1, 1], [], []>} : vector<1x32xf32>, vector<32x512xf32>, vector<1x512xf32> -> vector<1x512xf32>
    %145 = arith.addf %142, %144 : vector<1x512xf32>
    %146 = math.tanh %145 : vector<1x512xf32>
    %147 = vector.extract_strided_slice %146 {offsets = [0, 0], sizes = [1, 128], strides = [1, 1]} : vector<1x512xf32> to vector<1x128xf32>
    %cst_54 = arith.constant 1.000000e+00 : f32
    %148 = vector.broadcast %cst_54 : f32 to vector<1x128xf32>
    %149 = arith.addf %147, %148 : vector<1x128xf32>
    %cst_55 = arith.constant 5.000000e-01 : f32
    %150 = vector.broadcast %cst_55 : f32 to vector<1x128xf32>
    %151 = arith.mulf %150, %149 : vector<1x128xf32>
    %152 = vector.extract_strided_slice %146 {offsets = [0, 128], sizes = [1, 128], strides = [1, 1]} : vector<1x512xf32> to vector<1x128xf32>
    %cst_56 = arith.constant 1.000000e+00 : f32
    %153 = vector.broadcast %cst_56 : f32 to vector<1x128xf32>
    %154 = arith.addf %152, %153 : vector<1x128xf32>
    %cst_57 = arith.constant 5.000000e-01 : f32
    %155 = vector.broadcast %cst_57 : f32 to vector<1x128xf32>
    %156 = arith.mulf %155, %154 : vector<1x128xf32>
    %157 = vector.extract_strided_slice %146 {offsets = [0, 256], sizes = [1, 128], strides = [1, 1]} : vector<1x512xf32> to vector<1x128xf32>
    %158 = vector.extract_strided_slice %146 {offsets = [0, 384], sizes = [1, 128], strides = [1, 1]} : vector<1x512xf32> to vector<1x128xf32>
    %cst_58 = arith.constant 1.000000e+00 : f32
    %159 = vector.broadcast %cst_58 : f32 to vector<1x128xf32>
    %160 = arith.addf %158, %159 : vector<1x128xf32>
    %cst_59 = arith.constant 5.000000e-01 : f32
    %161 = vector.broadcast %cst_59 : f32 to vector<1x128xf32>
    %162 = arith.mulf %161, %160 : vector<1x128xf32>
    %163 = arith.mulf %156, %139 : vector<1x128xf32>
    %164 = arith.mulf %151, %157 : vector<1x128xf32>
    %165 = arith.addf %163, %164 : vector<1x128xf32>
    %166 = math.tanh %165 : vector<1x128xf32>
    %167 = arith.mulf %162, %166 : vector<1x128xf32>
    %c6 = arith.constant 6 : index
    %c0_60 = arith.constant 0 : index
    %168 = vector.load %arg3[%c6, %c0_60] : memref<8x512xf32, #tpu.memory_space<vmem>>, vector<1x512xf32>
    %169 = vector.extract_strided_slice %167 {offsets = [0, 0], sizes = [1, 32], strides = [1, 1]} : vector<1x128xf32> to vector<1x32xf32>
    %cst_61 = arith.constant dense<0.000000e+00> : vector<1x512xf32>
    %170 = tpu.matmul %169, %2, %cst_61 {dimension_numbers = #tpu.dot_dimension_numbers<[1], [0], [0], [1], [0, 0, 1, 1], [], []>} : vector<1x32xf32>, vector<32x512xf32>, vector<1x512xf32> -> vector<1x512xf32>
    %171 = arith.addf %168, %170 : vector<1x512xf32>
    %172 = math.tanh %171 : vector<1x512xf32>
    %173 = vector.extract_strided_slice %172 {offsets = [0, 0], sizes = [1, 128], strides = [1, 1]} : vector<1x512xf32> to vector<1x128xf32>
    %cst_62 = arith.constant 1.000000e+00 : f32
    %174 = vector.broadcast %cst_62 : f32 to vector<1x128xf32>
    %175 = arith.addf %173, %174 : vector<1x128xf32>
    %cst_63 = arith.constant 5.000000e-01 : f32
    %176 = vector.broadcast %cst_63 : f32 to vector<1x128xf32>
    %177 = arith.mulf %176, %175 : vector<1x128xf32>
    %178 = vector.extract_strided_slice %172 {offsets = [0, 128], sizes = [1, 128], strides = [1, 1]} : vector<1x512xf32> to vector<1x128xf32>
    %cst_64 = arith.constant 1.000000e+00 : f32
    %179 = vector.broadcast %cst_64 : f32 to vector<1x128xf32>
    %180 = arith.addf %178, %179 : vector<1x128xf32>
    %cst_65 = arith.constant 5.000000e-01 : f32
    %181 = vector.broadcast %cst_65 : f32 to vector<1x128xf32>
    %182 = arith.mulf %181, %180 : vector<1x128xf32>
    %183 = vector.extract_strided_slice %172 {offsets = [0, 256], sizes = [1, 128], strides = [1, 1]} : vector<1x512xf32> to vector<1x128xf32>
    %184 = vector.extract_strided_slice %172 {offsets = [0, 384], sizes = [1, 128], strides = [1, 1]} : vector<1x512xf32> to vector<1x128xf32>
    %cst_66 = arith.constant 1.000000e+00 : f32
    %185 = vector.broadcast %cst_66 : f32 to vector<1x128xf32>
    %186 = arith.addf %184, %185 : vector<1x128xf32>
    %cst_67 = arith.constant 5.000000e-01 : f32
    %187 = vector.broadcast %cst_67 : f32 to vector<1x128xf32>
    %188 = arith.mulf %187, %186 : vector<1x128xf32>
    %189 = arith.mulf %182, %165 : vector<1x128xf32>
    %190 = arith.mulf %177, %183 : vector<1x128xf32>
    %191 = arith.addf %189, %190 : vector<1x128xf32>
    %192 = math.tanh %191 : vector<1x128xf32>
    %193 = arith.mulf %188, %192 : vector<1x128xf32>
    %c7 = arith.constant 7 : index
    %c0_68 = arith.constant 0 : index
    %194 = vector.load %arg3[%c7, %c0_68] : memref<8x512xf32, #tpu.memory_space<vmem>>, vector<1x512xf32>
    %195 = vector.extract_strided_slice %193 {offsets = [0, 0], sizes = [1, 32], strides = [1, 1]} : vector<1x128xf32> to vector<1x32xf32>
    %cst_69 = arith.constant dense<0.000000e+00> : vector<1x512xf32>
    %196 = tpu.matmul %195, %2, %cst_69 {dimension_numbers = #tpu.dot_dimension_numbers<[1], [0], [0], [1], [0, 0, 1, 1], [], []>} : vector<1x32xf32>, vector<32x512xf32>, vector<1x512xf32> -> vector<1x512xf32>
    %197 = arith.addf %194, %196 : vector<1x512xf32>
    %198 = math.tanh %197 : vector<1x512xf32>
    %199 = vector.extract_strided_slice %198 {offsets = [0, 0], sizes = [1, 128], strides = [1, 1]} : vector<1x512xf32> to vector<1x128xf32>
    %cst_70 = arith.constant 1.000000e+00 : f32
    %200 = vector.broadcast %cst_70 : f32 to vector<1x128xf32>
    %201 = arith.addf %199, %200 : vector<1x128xf32>
    %cst_71 = arith.constant 5.000000e-01 : f32
    %202 = vector.broadcast %cst_71 : f32 to vector<1x128xf32>
    %203 = arith.mulf %202, %201 : vector<1x128xf32>
    %204 = vector.extract_strided_slice %198 {offsets = [0, 128], sizes = [1, 128], strides = [1, 1]} : vector<1x512xf32> to vector<1x128xf32>
    %cst_72 = arith.constant 1.000000e+00 : f32
    %205 = vector.broadcast %cst_72 : f32 to vector<1x128xf32>
    %206 = arith.addf %204, %205 : vector<1x128xf32>
    %cst_73 = arith.constant 5.000000e-01 : f32
    %207 = vector.broadcast %cst_73 : f32 to vector<1x128xf32>
    %208 = arith.mulf %207, %206 : vector<1x128xf32>
    %209 = vector.extract_strided_slice %198 {offsets = [0, 256], sizes = [1, 128], strides = [1, 1]} : vector<1x512xf32> to vector<1x128xf32>
    %210 = vector.extract_strided_slice %198 {offsets = [0, 384], sizes = [1, 128], strides = [1, 1]} : vector<1x512xf32> to vector<1x128xf32>
    %cst_74 = arith.constant 1.000000e+00 : f32
    %211 = vector.broadcast %cst_74 : f32 to vector<1x128xf32>
    %212 = arith.addf %210, %211 : vector<1x128xf32>
    %cst_75 = arith.constant 5.000000e-01 : f32
    %213 = vector.broadcast %cst_75 : f32 to vector<1x128xf32>
    %214 = arith.mulf %213, %212 : vector<1x128xf32>
    %215 = arith.mulf %208, %191 : vector<1x128xf32>
    %216 = arith.mulf %203, %209 : vector<1x128xf32>
    %217 = arith.addf %215, %216 : vector<1x128xf32>
    %218 = math.tanh %217 : vector<1x128xf32>
    %219 = arith.mulf %214, %218 : vector<1x128xf32>
    %220 = vector.extract_strided_slice %219 {offsets = [0, 0], sizes = [1, 32], strides = [1, 1]} : vector<1x128xf32> to vector<1x32xf32>
    %cst_76 = arith.constant dense<0.000000e+00> : vector<1x1xf32>
    %221 = tpu.matmul %220, %3, %cst_76 {dimension_numbers = #tpu.dot_dimension_numbers<[1], [0], [0], [1], [0, 0, 1, 1], [], []>} : vector<1x32xf32>, vector<32x1xf32>, vector<1x1xf32> -> vector<1x1xf32>
    %222 = arith.addf %221, %4 : vector<1x1xf32>
    %c0_77 = arith.constant 0 : index
    %c0_78 = arith.constant 0 : index
    %223 = vector.load %arg2[%c0_77, %c0_78] : memref<1x1xf32, #tpu.memory_space<vmem>>, vector<1x1xf32>
    tpu.vector_store %arg2[%c0_77, %c0_78], %222 {strides = array<i32>} : memref<1x1xf32, #tpu.memory_space<vmem>>, vector<1x1xf32>,
    return
  }
}

</mosaic_0001>

<bundles_post_ra>
// kernel: tpu_custom_call.1
= control target key start
LH: loop header
LB: loop body
LE: loop exit
PB: predicated region body
PF: predicated region fallthrough
CT: control target
= control target key end

     0   :  { %7 = vsyncpa [#allocation4], 0  ;;  %s2353_s0 = inlined_call_operand.vmem [shape: f32[8,4], index: 0, kind: input, shape index: {}]   ;;  %s2354_s1 = inlined_call_operand.hbm [shape: f32[88,512], index: 1, kind: input, shape index: {}]   ;;  %s2355_s2 = inlined_call_operand.hbm [shape: f32[1,1], index: 2, kind: output, shape index: {}]  }
   0x1   :  { %8 = vsyncpa [#allocation5], 0  ;;  %s2155_s9 = smov [#allocation3]   ;;  %s2107_s13 = scalar_lea.hbm %s2354_s1, 5632 }
   0x2   :  { %s16_s10 = sshll.u32 %s2155_s9, 4  ;;  %p2108_p0 = scmp.ne.s32.totalorder %s2354_s1, %s2107_s13  ;;  %s17_s10 = int_to_ptr.vmem [resolvable:$true] %s16_s10 }
   0x3   :  { %p2111_p1 = scmp.lt.u32.totalorder %s2107_s13, %s2354_s1 }
   0x5   :  { %p2113_p2 = pnand %p2111_p1, %p2108_p0 }
   0x7   :  { %2116 = shalt.err (!%p2113_p2)
}
   0x8   :  { %s2117_s18 = scalar_lea.vmem %s17_s10, 5632  ;;  %p2122_p4 = scmp.lt.s32.totalorder %s17_s10, %s17_s10 }
   0x9   :  { %p2118_p3 = scmp.ne.s32.totalorder %s17_s10, %s2117_s18  ;;  %p2123_p5 = scmp.lt.s32.totalorder %s2117_s18, %s2117_s18 }
   0xb   :  { %p2124_p6 = por %p2123_p5, %p2122_p4 }
   0xd   :  { %p2125_p7 = pnand %p2124_p6, %p2118_p3 }
   0xf   :  { %2128 = shalt.err (!%p2125_p7)
}
  0x10   :  { %s2156_s19 = smov 512   ;;  %s2157_s20 = smov 32  }
  0x11   :  { %22 = dma.hbm_to_vmem [thread:$0]  %s2354_s1, 5632, %s17_s10, [#allocation4], %s2156_s19, %s2156_s19, %s2157_s20  }
  0x12   :  { %2151 = dma.done.wait [#allocation4], 5632  }
  0x13   :  { %2152 = vsyncadd [#allocation4], 4294961664  ;;  %v2158_v0 = vmov 0.0   ;;  %vm79_vm0 = vcmask 1043456   ;;  %v27_v1 = vld [vmem:[#allocation3 + $0x8] sm:$0xf]  ;;  %v55_v30 = vlaneseq }
  0x14   :  { %156 = vmatprep.mubr.f32.mxu1 %v2158_v0  ;;  %307 = vmatprep.mubr.f32.mxu0 %v2158_v0  ;;  %v26_v2 = vld [vmem:[#allocation3] sm:$0xf]  ;;  %vm75_vm1 = vcmask 31744   ;;  %v29_v4 = vld [vmem:[#allocation3 + $0x18] sm:$0xf]  ;;  %v33_v6 = vld [vmem:[#allocation3 + $0x48] sm:$0xff] }
  0x15   :  { %v53_v3 = vld [vmem:[%s2353_s0] sm:$0xff]  ;;  %1896 = vmatprep.subr.msk.mxu1 %vm79_vm0, %v27_v1  ;;  %v28_v5 = vld [vmem:[#allocation3 + $0x10] sm:$0xf]  ;;  %v37_v7 = vld [vmem:[#allocation3 + $0x68] sm:$0xff]  ;;  %v56_v31 = vshrl.u32 %v55_v30, 7  ;;  %vm239_vm2 = vcmask 261120  }
  0x16   :  { %1897 = vmatpush1.msk.msra.mxu1 %vm79_vm0, %v26_v2  ;;  %v35_v8 = vld [vmem:[#allocation3 + $0x58] sm:$0xff]  ;;  %v2199_v10 = vpack.c.bf16 %v37_v7, %v33_v6  ;;  %v32_v12 = vld [vmem:[#allocation3 + $0x40] sm:$0xff]  ;;  %v34_v14 = vld [vmem:[#allocation3 + $0x50] sm:$0xff]  ;;  %v2159_v43 = vmov 1966171168   ;;  %vm2161_vm3 = vmmov 0  }
  0x17   :  { %v39_v9 = vld [vmem:[#allocation3 + $0x78] sm:$0xff]  ;;  %1898 = vmatmul.mubr.msk.f32.vlgmr.msra.gmra.mrb[0].mxu1 %vm75_vm1, %v53_v3  ;;  %1899 = vmatprep.subr.msk.mxu1 %vm79_vm0, %v29_v4  ;;  %v36_v13 = vld [vmem:[#allocation3 + $0x60] sm:$0xff]  ;;  %v38_v16 = vld [vmem:[#allocation3 + $0x70] sm:$0xff]  ;;  %v57_v32 = vsub.s32 0, %v56_v31  ;;  %v61_v34 = vsub.s32 1, %v56_v31  ;;  %v65_v36 = vsub.s32 2, %v56_v31  ;;  %v392_v44 = vunpack.c.l.s4 %v2159_v43 }
  0x18   :  { %v2201_v11 = vpack.c.bf16 %v39_v9, %v35_v8  ;;  %1900 = vmatpush1.msk.msra.mxu1 %vm79_vm0, %v28_v5  ;;  %227 = vmatprep.mubr.f32.mxu1 %v2158_v0  ;;  %v2205_v15 = vpack.c.bf16 %v36_v13, %v32_v12  ;;  %v41_v17 = vld [vmem:[#allocation3 + $0x88] sm:$0xff]  ;;  %v2209_v19 = vpack.c.bf16 %v38_v16, %v34_v14  ;;  %v43_v21 = vld [vmem:[#allocation3 + $0x98] sm:$0xff]  ;;  %v40_v23 = vld [vmem:[#allocation3 + $0x80] sm:$0xff]  ;;  %v69_v38 = vsub.s32 3, %v56_v31  ;;  %s2162_s0 = smov [#allocation6]  }
  0x19   :  { %v45_v18 = vld [vmem:[#allocation3 + $0xa8] sm:$0xff]  ;;  %1934 = vmatprep.subr.bf16.mxu0 %v2199_v10  ;;  %v47_v22 = vld [vmem:[#allocation3 + $0xb8] sm:$0xff]  ;;  %v44_v25 = vld [vmem:[#allocation3 + $0xa0] sm:$0xff]  ;;  %v393_v50 = vunpack.c.0.s8 %v392_v44  ;;  %s1887_s1 = sshll.u32 %s2162_s0, 4  ;;  %vm1879_vm4 = vcmask 0   ;;  %s1888_s1 = int_to_ptr.vmem [resolvable:$true] %s1887_s1 }
  0x1a   :  { %1942 = vmatprep.subr.bf16.mxu1 %v2201_v11  ;;  %v2211_v20 = vpack.c.bf16 %v45_v18, %v41_v17  ;;  %1936 = vmatpush1.bf16.msra.mxu0 %v2205_v15  ;;  %v2214_v24 = vpack.c.bf16 %v47_v22, %v43_v21  ;;  %v42_v26 = vld [vmem:[#allocation3 + $0x90] sm:$0xff]  ;;  %v2218_v28 = vpack.c.bf16 %v44_v25, %v40_v23  ;;  %s2129_s25 = scalar_lea.vmem %s1888_s1, 16  ;;  %s2133_s26 = scalar_lea.vmem %s1888_s1, 32 }
  0x1b   :  { %v46_v27 = vld [vmem:[#allocation3 + $0xb0] sm:$0xff]  ;;  %1901 = vmatmul.mubr.msk.f32.vlgmr.msra.gmra.mrb[2].mxu1 %vm75_vm1, %v53_v3  ;;  %v2241_v52 = vsub.s32 %v393_v50, %v56_v31  ;;  %p2130_p8 = scmp.ne.s32.totalorder %s1888_s1, %s2129_s25  ;;  %p2134_p9 = scmp.lt.s32.totalorder %s1888_s1, %s1888_s1 }
  0x1c   :  { %1938 = vmatprep.subr.bf16.mxu0 %v2211_v20  ;;  %1944 = vmatpush1.bf16.msra.mxu1 %v2209_v19  ;;  %v2221_v29 = vpack.c.bf16 %v46_v27, %v42_v26  ;;  %v31_v33 = vld [vmem:[#allocation3 + $0x20] ss:$8 sm:$0xf]  ;;  %p2135_p10 = scmp.lt.s32.totalorder %s2133_s26, %s2129_s25 }
  0x1d   :  { %378 = vmatprep.mubr.f32.mxu1 %v2158_v0  ;;  %1946 = vmatprep.subr.bf16.mxu1 %v2214_v24  ;;  %v58_v35 = vrot.slane %v31_v33, %v57_v32  ;;  %v62_v37 = vrot.slane %v31_v33, %v61_v34  ;;  %v66_v42 = vrot.slane %v31_v33, %v65_v36 }
  0x1e   :  { %1940 = vmatpush1.bf16.msra.mxu0 %v2218_v28  ;;  %v70_v46 = vrot.slane %v31_v33, %v69_v38  ;;  %p2136_p11 = por %p2135_p10, %p2134_p9 }
  0x1f   :  { %1950 = vmatprep.subr.bf16.mxu0 %v2199_v10 }
  0x20   :  { %1948 = vmatpush1.bf16.msra.mxu1 %v2221_v29  ;;  %p2137_p12 = pnand %p2136_p11, %p2130_p8 }
  0x21   :  { %308 = vmatmul.mubr.f32.vlgmr.msra.gmra.mrb[0].mxu0 %v2158_v0  ;;  %1958 = vmatprep.subr.bf16.mxu1 %v2201_v11 }
  0x22   :  { %1952 = vmatpush1.bf16.msra.mxu0 %v2205_v15  ;;  %503 = vmatprep.mubr.f32.mxu0 %v2158_v0 }
  0x23   :  { %379 = vmatmul.mubr.f32.vlgmr.msra.gmra.mrb[4].mxu1 %v2158_v0  ;;  %1954 = vmatprep.subr.bf16.mxu0 %v2211_v20 }
  0x24   :  { %1960 = vmatpush1.bf16.msra.mxu1 %v2209_v19  ;;  %574 = vmatprep.mubr.f32.mxu1 %v2158_v0 }
  0x25   :  { %1962 = vmatprep.subr.bf16.mxu1 %v2214_v24 }
  0x26   :  { %1956 = vmatpush1.bf16.msra.mxu0 %v2218_v28 }
  0x27   :  { %1966 = vmatprep.subr.bf16.mxu0 %v2199_v10 }
  0x28   :  { %1964 = vmatpush1.bf16.msra.mxu1 %v2221_v29 }
  0x29   :  { %1974 = vmatprep.subr.bf16.mxu1 %v2201_v11 }
  0xea   :  { %v158_v39 = vpop.f32.mrb[0].mxu1 }
  0xeb   :  { %v159_v40 = vadd.f32 %v158_v39, %v58_v35  ;;  %v160_v41 = vpop.f32.mrb[1].mxu1 }
  0xec   :  { %v161_v45 = vadd.f32 %v160_v41, %v62_v37 }
  0xed   :  { %234 = vst [vmem:[#allocation2] sm:$0xff] %v159_v40 }
  0xee   :  { %235 = vst [vmem:[#allocation2 + $0x8] sm:$0xff] %v161_v45  ;;  %v229_v47 = vpop.f32.mrb[2].mxu1 }
  0xef   :  { %v230_v48 = vadd.f32 %v229_v47, %v66_v42  ;;  %v231_v49 = vpop.f32.mrb[3].mxu1 }
  0xf0   :  { %v232_v51 = vadd.f32 %v231_v49, %v70_v46 }
  0xf1   :  { %236 = vst [vmem:[#allocation2 + $0x10] sm:$0xff] %v230_v48 }
  0xf2   :  { %237 = vst [vmem:[#allocation2 + $0x18] sm:$0xff] %v232_v51 }
  0xf4   :  { %v309_v53 = vpop.f32.mrb[0].mxu0 }
  0xf5   :  { %v311_v54 = vpop.f32.mrb[1].mxu0 }
  0xf6   :  { %v380_v55 = vpop.f32.mrb[4].mxu1  ;;  %v389_v56 = vcombine.low %v309_v53, %v311_v54 }
  0xf7   :  { %v382_v57 = vpop.f32.mrb[5].mxu1 }
  0xf8   :  { %v397_v58 = vrot.slane %v389_v56, %v2241_v52  ;;  %v390_v59 = vcombine.low %v380_v55, %v382_v57 }
  0xf9   :  { %v238_v63 = vld [vmem:[#allocation2] ss:$8 sm:$0xf]  ;;  %v435_v35 = vld [vmem:[#allocation2 + $0x1] ss:$8 sm:$0xf] }
  0xfa   :  { %v404_v60 = vrot.slane %v390_v59, %v2241_v52 }
  0xfc   :  { %v405_v61 = vcombine.low %v397_v58, %v404_v60 }
  0xfe   :  { %v412_v62 = vrot.slane %v405_v61, %v2241_v52 }
 0x100   :  { %v414_v1 = vadd.f32 %v412_v62, %v238_v63  ;;  %v631_v63 = vld [vmem:[#allocation2 + $0x2] ss:$8 sm:$0xf] }
 0x102   :  { %2075 = vtanh.f32 %v414_v1 }
 0x10c   :  { %v2076_v2 = vpop.eup %2075 }
 0x10d   :  { %v416_v3 = vadd.f32 1.0, %v2076_v2  ;;  %v419_v4 = vrot.slane %v2076_v2, 1  ;;  %v428_v8 = vrot.slane %v2076_v2, 2  ;;  %v423_v14 = vrot.slane %v2076_v2, 3 }
 0x10f   :  { %v417_v5 = vmul.f32 0.5, %v416_v3  ;;  %v421_v6 = vadd.f32 1.0, %v419_v4  ;;  %v425_v16 = vadd.f32 1.0, %v423_v14 }
 0x111   :  { %v422_v7 = vmul.f32 0.5, %v421_v6  ;;  %v430_v12 = vmul.f32 %v428_v8, %v417_v5  ;;  %v426_v17 = vmul.f32 0.5, %v425_v16 }
 0x113   :  { %v427_v9 = vmul.f32 0.0, %v422_v7 }
 0x115   :  { %v431_v13 = vadd.f32 %v430_v12, %v427_v9 }
 0x117   :  { %2077 = vtanh.f32 %v431_v13 }
 0x121   :  { %v2078_v18 = vpop.eup %2077 }
 0x122   :  { %v433_v21 = vmul.f32 %v2078_v18, %v426_v17 }
 0x124   :  { %1902 = vmatmul.mubr.msk.f32.vlgmr.msra.gmra.mrb[2].mxu0 %vm239_vm2, %v433_v21  ;;  %1903 = vmatmul.mubr.msk.f32.vlgmr.msra.gmra.mrb[6].mxu1 %vm239_vm2, %v433_v21 }
 0x125   :  { %1968 = vmatpush1.bf16.msra.mxu0 %v2205_v15  ;;  %1976 = vmatpush1.bf16.msra.mxu1 %v2209_v19 }
 0x126   :  { %1970 = vmatprep.subr.bf16.mxu0 %v2211_v20  ;;  %1978 = vmatprep.subr.bf16.mxu1 %v2214_v24 }
 0x127   :  { %699 = vmatprep.mubr.f32.mxu0 %v2158_v0  ;;  %770 = vmatprep.mubr.f32.mxu1 %v2158_v0 }
 0x129   :  { %1972 = vmatpush1.bf16.msra.mxu0 %v2218_v28  ;;  %1980 = vmatpush1.bf16.msra.mxu1 %v2221_v29 }
 0x12a   :  { %1982 = vmatprep.subr.bf16.mxu0 %v2199_v10  ;;  %1990 = vmatprep.subr.bf16.mxu1 %v2201_v11 }
 0x1f7   :  { %v505_v22 = vpop.f32.mrb[2].mxu0  ;;  %v576_v23 = vpop.f32.mrb[6].mxu1 }
 0x1f8   :  { %v507_v25 = vpop.f32.mrb[3].mxu0  ;;  %v578_v26 = vpop.f32.mrb[7].mxu1 }
 0x1f9   :  { %v585_v27 = vcombine.low %v505_v22, %v507_v25  ;;  %v586_v30 = vcombine.low %v576_v23, %v578_v26 }
 0x1fb   :  { %v593_v31 = vrot.slane %v585_v27, %v2241_v52  ;;  %v600_v32 = vrot.slane %v586_v30, %v2241_v52 }
 0x1fd   :  { %v601_v33 = vcombine.low %v593_v31, %v600_v32 }
 0x1ff   :  { %v608_v34 = vrot.slane %v601_v33, %v2241_v52 }
 0x201   :  { %v610_v36 = vadd.f32 %v608_v34, %v435_v35  ;;  %v827_v35 = vld [vmem:[#allocation2 + $0x3] ss:$8 sm:$0xf] }
 0x203   :  { %2079 = vtanh.f32 %v610_v36 }
 0x20d   :  { %v2080_v37 = vpop.eup %2079 }
 0x20e   :  { %v612_v38 = vadd.f32 1.0, %v2080_v37  ;;  %v615_v39 = vrot.slane %v2080_v37, 1  ;;  %v624_v43 = vrot.slane %v2080_v37, 2  ;;  %v619_v47 = vrot.slane %v2080_v37, 3 }
 0x210   :  { %v613_v40 = vmul.f32 0.5, %v612_v38  ;;  %v617_v41 = vadd.f32 1.0, %v615_v39  ;;  %v621_v48 = vadd.f32 1.0, %v619_v47 }
 0x212   :  { %v618_v42 = vmul.f32 0.5, %v617_v41  ;;  %v626_v45 = vmul.f32 %v624_v43, %v613_v40  ;;  %v622_v49 = vmul.f32 0.5, %v621_v48 }
 0x214   :  { %v623_v44 = vmul.f32 %v618_v42, %v431_v13 }
 0x216   :  { %v627_v46 = vadd.f32 %v626_v45, %v623_v44 }
 0x218   :  { %2081 = vtanh.f32 %v627_v46 }
 0x222   :  { %v2082_v50 = vpop.eup %2081 }
 0x223   :  { %v629_v51 = vmul.f32 %v2082_v50, %v622_v49 }
 0x225   :  { %1904 = vmatmul.mubr.msk.f32.vlgmr.msra.gmra.mrb[4].mxu0 %vm239_vm2, %v629_v51  ;;  %1905 = vmatmul.mubr.msk.f32.vlgmr.msra.gmra.mrb[8].mxu1 %vm239_vm2, %v629_v51 }
 0x226   :  { %1984 = vmatpush1.bf16.msra.mxu0 %v2205_v15  ;;  %1992 = vmatpush1.bf16.msra.mxu1 %v2209_v19 }
 0x227   :  { %1986 = vmatprep.subr.bf16.mxu0 %v2211_v20  ;;  %1994 = vmatprep.subr.bf16.mxu1 %v2214_v24 }
 0x228   :  { %895 = vmatprep.mubr.f32.mxu0 %v2158_v0  ;;  %966 = vmatprep.mubr.f32.mxu1 %v2158_v0 }
 0x22a   :  { %1988 = vmatpush1.bf16.msra.mxu0 %v2218_v28  ;;  %1996 = vmatpush1.bf16.msra.mxu1 %v2221_v29 }
 0x22b   :  { %1998 = vmatprep.subr.bf16.mxu0 %v2199_v10  ;;  %2006 = vmatprep.subr.bf16.mxu1 %v2201_v11 }
 0x2f8   :  { %v701_v53 = vpop.f32.mrb[4].mxu0  ;;  %v772_v54 = vpop.f32.mrb[8].mxu1 }
 0x2f9   :  { %v703_v55 = vpop.f32.mrb[5].mxu0  ;;  %v774_v56 = vpop.f32.mrb[9].mxu1 }
 0x2fa   :  { %v781_v57 = vcombine.low %v701_v53, %v703_v55  ;;  %v782_v58 = vcombine.low %v772_v54, %v774_v56 }
 0x2fc   :  { %v789_v59 = vrot.slane %v781_v57, %v2241_v52  ;;  %v796_v60 = vrot.slane %v782_v58, %v2241_v52 }
 0x2fe   :  { %v797_v61 = vcombine.low %v789_v59, %v796_v60 }
 0x300   :  { %v804_v62 = vrot.slane %v797_v61, %v2241_v52 }
 0x302   :  { %v806_v1 = vadd.f32 %v804_v62, %v631_v63  ;;  %v1023_v63 = vld [vmem:[#allocation2 + $0x4] ss:$8 sm:$0xf] }
 0x304   :  { %2083 = vtanh.f32 %v806_v1 }
 0x30e   :  { %v2084_v2 = vpop.eup %2083 }
 0x30f   :  { %v808_v3 = vadd.f32 1.0, %v2084_v2  ;;  %v811_v4 = vrot.slane %v2084_v2, 1  ;;  %v820_v8 = vrot.slane %v2084_v2, 2  ;;  %v815_v14 = vrot.slane %v2084_v2, 3 }
 0x311   :  { %v809_v5 = vmul.f32 0.5, %v808_v3  ;;  %v813_v6 = vadd.f32 1.0, %v811_v4  ;;  %v817_v16 = vadd.f32 1.0, %v815_v14 }
 0x313   :  { %v814_v7 = vmul.f32 0.5, %v813_v6  ;;  %v822_v12 = vmul.f32 %v820_v8, %v809_v5  ;;  %v818_v17 = vmul.f32 0.5, %v817_v16 }
 0x315   :  { %v819_v9 = vmul.f32 %v814_v7, %v627_v46 }
 0x317   :  { %v823_v13 = vadd.f32 %v822_v12, %v819_v9 }
 0x319   :  { %2085 = vtanh.f32 %v823_v13 }
 0x323   :  { %v2086_v18 = vpop.eup %2085 }
 0x324   :  { %v825_v21 = vmul.f32 %v2086_v18, %v818_v17 }
 0x326   :  { %1906 = vmatmul.mubr.msk.f32.vlgmr.msra.gmra.mrb[6].mxu0 %vm239_vm2, %v825_v21  ;;  %1907 = vmatmul.mubr.msk.f32.vlgmr.msra.gmra.mrb[10].mxu1 %vm239_vm2, %v825_v21 }
 0x327   :  { %2000 = vmatpush1.bf16.msra.mxu0 %v2205_v15  ;;  %2008 = vmatpush1.bf16.msra.mxu1 %v2209_v19 }
 0x328   :  { %2002 = vmatprep.subr.bf16.mxu0 %v2211_v20  ;;  %2010 = vmatprep.subr.bf16.mxu1 %v2214_v24 }
 0x329   :  { %1091 = vmatprep.mubr.f32.mxu0 %v2158_v0  ;;  %1162 = vmatprep.mubr.f32.mxu1 %v2158_v0 }
 0x32b   :  { %2004 = vmatpush1.bf16.msra.mxu0 %v2218_v28  ;;  %2012 = vmatpush1.bf16.msra.mxu1 %v2221_v29 }
 0x32c   :  { %2014 = vmatprep.subr.bf16.mxu0 %v2199_v10  ;;  %2022 = vmatprep.subr.bf16.mxu1 %v2201_v11 }
 0x3f9   :  { %v897_v22 = vpop.f32.mrb[6].mxu0  ;;  %v968_v23 = vpop.f32.mrb[10].mxu1 }
 0x3fa   :  { %v899_v25 = vpop.f32.mrb[7].mxu0  ;;  %v970_v26 = vpop.f32.mrb[11].mxu1 }
 0x3fb   :  { %v977_v27 = vcombine.low %v897_v22, %v899_v25  ;;  %v978_v30 = vcombine.low %v968_v23, %v970_v26 }
 0x3fd   :  { %v985_v31 = vrot.slane %v977_v27, %v2241_v52  ;;  %v992_v32 = vrot.slane %v978_v30, %v2241_v52 }
 0x3ff   :  { %v993_v33 = vcombine.low %v985_v31, %v992_v32 }
 0x401   :  { %v1000_v34 = vrot.slane %v993_v33, %v2241_v52 }
 0x403   :  { %v1002_v36 = vadd.f32 %v1000_v34, %v827_v35  ;;  %v1219_v35 = vld [vmem:[#allocation2 + $0x5] ss:$8 sm:$0xf] }
 0x405   :  { %2087 = vtanh.f32 %v1002_v36 }
 0x40f   :  { %v2088_v37 = vpop.eup %2087 }
 0x410   :  { %v1004_v38 = vadd.f32 1.0, %v2088_v37  ;;  %v1007_v39 = vrot.slane %v2088_v37, 1  ;;  %v1016_v43 = vrot.slane %v2088_v37, 2  ;;  %v1011_v47 = vrot.slane %v2088_v37, 3 }
 0x412   :  { %v1005_v40 = vmul.f32 0.5, %v1004_v38  ;;  %v1009_v41 = vadd.f32 1.0, %v1007_v39  ;;  %v1013_v48 = vadd.f32 1.0, %v1011_v47 }
 0x414   :  { %v1010_v42 = vmul.f32 0.5, %v1009_v41  ;;  %v1018_v45 = vmul.f32 %v1016_v43, %v1005_v40  ;;  %v1014_v49 = vmul.f32 0.5, %v1013_v48 }
 0x416   :  { %v1015_v44 = vmul.f32 %v1010_v42, %v823_v13 }
 0x418   :  { %v1019_v46 = vadd.f32 %v1018_v45, %v1015_v44 }
 0x41a   :  { %2089 = vtanh.f32 %v1019_v46 }
 0x424   :  { %v2090_v50 = vpop.eup %2089 }
 0x425   :  { %v1021_v51 = vmul.f32 %v2090_v50, %v1014_v49 }
 0x427   :  { %1908 = vmatmul.mubr.msk.f32.vlgmr.msra.gmra.mrb[8].mxu0 %vm239_vm2, %v1021_v51  ;;  %1909 = vmatmul.mubr.msk.f32.vlgmr.msra.gmra.mrb[12].mxu1 %vm239_vm2, %v1021_v51 }
 0x428   :  { %2016 = vmatpush1.bf16.msra.mxu0 %v2205_v15  ;;  %2024 = vmatpush1.bf16.msra.mxu1 %v2209_v19 }
 0x429   :  { %2018 = vmatprep.subr.bf16.mxu0 %v2211_v20  ;;  %2026 = vmatprep.subr.bf16.mxu1 %v2214_v24 }
 0x42a   :  { %1287 = vmatprep.mubr.f32.mxu0 %v2158_v0  ;;  %1358 = vmatprep.mubr.f32.mxu1 %v2158_v0 }
 0x42c   :  { %2020 = vmatpush1.bf16.msra.mxu0 %v2218_v28  ;;  %2028 = vmatpush1.bf16.msra.mxu1 %v2221_v29 }
 0x42d   :  { %2030 = vmatprep.subr.bf16.mxu0 %v2199_v10  ;;  %2038 = vmatprep.subr.bf16.mxu1 %v2201_v11 }
 0x4fa   :  { %v1093_v53 = vpop.f32.mrb[8].mxu0  ;;  %v1164_v54 = vpop.f32.mrb[12].mxu1 }
 0x4fb   :  { %v1095_v55 = vpop.f32.mrb[9].mxu0  ;;  %v1166_v56 = vpop.f32.mrb[13].mxu1 }
 0x4fc   :  { %v1173_v57 = vcombine.low %v1093_v53, %v1095_v55  ;;  %v1174_v58 = vcombine.low %v1164_v54, %v1166_v56 }
 0x4fe   :  { %v1181_v59 = vrot.slane %v1173_v57, %v2241_v52  ;;  %v1188_v60 = vrot.slane %v1174_v58, %v2241_v52  ;;  %v1415_v57 = vld [vmem:[#allocation2 + $0x6] ss:$8 sm:$0xf] }
 0x500   :  { %v1189_v61 = vcombine.low %v1181_v59, %v1188_v60 }
 0x502   :  { %v1196_v62 = vrot.slane %v1189_v61, %v2241_v52 }
 0x504   :  { %v1198_v1 = vadd.f32 %v1196_v62, %v1023_v63 }
 0x506   :  { %2091 = vtanh.f32 %v1198_v1 }
 0x510   :  { %v2092_v2 = vpop.eup %2091 }
 0x511   :  { %v1200_v3 = vadd.f32 1.0, %v2092_v2  ;;  %v1203_v4 = vrot.slane %v2092_v2, 1  ;;  %v1212_v8 = vrot.slane %v2092_v2, 2  ;;  %v1207_v14 = vrot.slane %v2092_v2, 3 }
 0x513   :  { %v1201_v5 = vmul.f32 0.5, %v1200_v3  ;;  %v1205_v6 = vadd.f32 1.0, %v1203_v4  ;;  %v1209_v16 = vadd.f32 1.0, %v1207_v14  ;;  %v2160_v14 = vmov 0.0|0.0  }
 0x515   :  { %v1206_v7 = vmul.f32 0.5, %v1205_v6  ;;  %v1214_v12 = vmul.f32 %v1212_v8, %v1201_v5  ;;  %v1210_v17 = vmul.f32 0.5, %v1209_v16 }
 0x517   :  { %v1211_v9 = vmul.f32 %v1206_v7, %v1019_v46 }
 0x519   :  { %v1215_v13 = vadd.f32 %v1214_v12, %v1211_v9  ;;  %v48_v9 = vld [vmem:[#allocation3 + $0xc0] sm:$0xff] }
 0x51a   :  { %v49_v12 = vld [vmem:[#allocation3 + $0xe0] sm:$0xff] }
 0x51b   :  { %2093 = vtanh.f32 %v1215_v13  ;;  %v2062_v16 = vpack.c.bf16 %v49_v12, %v48_v9 }
 0x525   :  { %v2094_v18 = vpop.eup %2093 }
 0x526   :  { %v1217_v21 = vmul.f32 %v2094_v18, %v1210_v17  ;;  %v51_v17 = vld [vmem:[#allocation3 + $0x120] sm:$0xff] }
 0x528   :  { %1910 = vmatmul.mubr.msk.f32.vlgmr.msra.gmra.mrb[10].mxu0 %vm239_vm2, %v1217_v21  ;;  %1911 = vmatmul.mubr.msk.f32.vlgmr.msra.gmra.mrb[14].mxu1 %vm239_vm2, %v1217_v21 }
 0x529   :  { %2032 = vmatpush1.bf16.msra.mxu0 %v2205_v15  ;;  %2040 = vmatpush1.bf16.msra.mxu1 %v2209_v19 }
 0x52a   :  { %2034 = vmatprep.subr.bf16.mxu0 %v2211_v20  ;;  %2042 = vmatprep.subr.bf16.mxu1 %v2214_v24 }
 0x52b   :  { %1483 = vmatprep.mubr.f32.mxu0 %v2158_v0  ;;  %1554 = vmatprep.mubr.f32.mxu1 %v2158_v0 }
 0x52d   :  { %2036 = vmatpush1.bf16.msra.mxu0 %v2218_v28  ;;  %2044 = vmatpush1.bf16.msra.mxu1 %v2221_v29 }
 0x52e   :  { %2046 = vmatprep.subr.bf16.mxu0 %v2199_v10  ;;  %2054 = vmatprep.subr.bf16.mxu1 %v2201_v11 }
 0x5fb   :  { %v1289_v22 = vpop.f32.mrb[10].mxu0  ;;  %v1360_v23 = vpop.f32.mrb[14].mxu1 }
 0x5fc   :  { %v1291_v25 = vpop.f32.mrb[11].mxu0  ;;  %v1362_v26 = vpop.f32.mrb[15].mxu1 }
 0x5fd   :  { %v1369_v27 = vcombine.low %v1289_v22, %v1291_v25  ;;  %v1370_v30 = vcombine.low %v1360_v23, %v1362_v26 }
 0x5ff   :  { %v1377_v31 = vrot.slane %v1369_v27, %v2241_v52  ;;  %v1384_v32 = vrot.slane %v1370_v30, %v2241_v52 }
 0x601   :  { %v1385_v33 = vcombine.low %v1377_v31, %v1384_v32 }
 0x603   :  { %v1392_v34 = vrot.slane %v1385_v33, %v2241_v52 }
 0x605   :  { %v1394_v36 = vadd.f32 %v1392_v34, %v1219_v35  ;;  %v1611_v34 = vld [vmem:[#allocation2 + $0x7] ss:$8 sm:$0xf] }
 0x607   :  { %2095 = vtanh.f32 %v1394_v36 }
 0x611   :  { %v2096_v37 = vpop.eup %2095 }
 0x612   :  { %v1396_v10 = vadd.f32 1.0, %v2096_v37  ;;  %v1399_v38 = vrot.slane %v2096_v37, 1  ;;  %v1408_v41 = vrot.slane %v2096_v37, 2  ;;  %v1403_v45 = vrot.slane %v2096_v37, 3 }
 0x614   :  { %v1397_v11 = vmul.f32 0.5, %v1396_v10  ;;  %v1401_v39 = vadd.f32 1.0, %v1399_v38  ;;  %v1405_v46 = vadd.f32 1.0, %v1403_v45 }
 0x616   :  { %v1402_v40 = vmul.f32 0.5, %v1401_v39  ;;  %v1410_v43 = vmul.f32 %v1408_v41, %v1397_v11  ;;  %v1406_v47 = vmul.f32 0.5, %v1405_v46 }
 0x618   :  { %v1407_v42 = vmul.f32 %v1402_v40, %v1215_v13  ;;  %v50_v13 = vld [vmem:[#allocation3 + $0x100] sm:$0xff] }
 0x619   :  { %v2065_v18 = vpack.c.bf16 %v51_v17, %v50_v13 }
 0x61a   :  { %v1411_v44 = vadd.f32 %v1410_v43, %v1407_v42 }
 0x61c   :  { %2097 = vtanh.f32 %v1411_v44 }
 0x626   :  { %v2098_v48 = vpop.eup %2097 }
 0x627   :  { %v1413_v49 = vmul.f32 %v2098_v48, %v1406_v47 }
 0x629   :  { %1912 = vmatmul.mubr.msk.f32.vlgmr.msra.gmra.mrb[12].mxu0 %vm239_vm2, %v1413_v49  ;;  %1913 = vmatmul.mubr.msk.f32.vlgmr.msra.gmra.mrb[16].mxu1 %vm239_vm2, %v1413_v49 }
 0x62a   :  { %2048 = vmatpush1.bf16.msra.mxu0 %v2205_v15  ;;  %2056 = vmatpush1.bf16.msra.mxu1 %v2209_v19 }
 0x62b   :  { %2050 = vmatprep.subr.bf16.mxu0 %v2211_v20  ;;  %2058 = vmatprep.subr.bf16.mxu1 %v2214_v24 }
 0x62c   :  { %1679 = vmatprep.mubr.f32.mxu0 %v2158_v0  ;;  %1750 = vmatprep.mubr.f32.mxu1 %v2158_v0 }
 0x62e   :  { %2052 = vmatpush1.bf16.msra.mxu0 %v2218_v28  ;;  %2060 = vmatpush1.bf16.msra.mxu1 %v2221_v29 }
 0x62f   :  { %2061 = vmatprep.subr.bf16.mxu0 %v2160_v14 }
 0x6fc   :  { %v1485_v50 = vpop.f32.mrb[12].mxu0  ;;  %v1556_v51 = vpop.f32.mrb[16].mxu1 }
 0x6fd   :  { %v1487_v53 = vpop.f32.mrb[13].mxu0  ;;  %v1558_v54 = vpop.f32.mrb[17].mxu1 }
 0x6fe   :  { %v1565_v55 = vcombine.low %v1485_v50, %v1487_v53  ;;  %v1566_v15 = vcombine.low %v1556_v51, %v1558_v54 }
 0x700   :  { %v1573_v19 = vrot.slane %v1565_v55, %v2241_v52  ;;  %v1580_v20 = vrot.slane %v1566_v15, %v2241_v52 }
 0x702   :  { %v1581_v56 = vcombine.low %v1573_v19, %v1580_v20 }
 0x704   :  { %v1588_v24 = vrot.slane %v1581_v56, %v2241_v52 }
 0x706   :  { %v1590_v58 = vadd.f32 %v1588_v24, %v1415_v57 }
 0x708   :  { %2099 = vtanh.f32 %v1590_v58 }
 0x712   :  { %v2100_v59 = vpop.eup %2099 }
 0x713   :  { %v1592_v28 = vadd.f32 1.0, %v2100_v59  ;;  %v1595_v60 = vrot.slane %v2100_v59, 1  ;;  %v1604_v63 = vrot.slane %v2100_v59, 2  ;;  %v1599_v4 = vrot.slane %v2100_v59, 3 }
 0x715   :  { %v1593_v29 = vmul.f32 0.5, %v1592_v28  ;;  %v1597_v61 = vadd.f32 1.0, %v1595_v60  ;;  %v1601_v5 = vadd.f32 1.0, %v1599_v4 }
 0x717   :  { %v1598_v62 = vmul.f32 0.5, %v1597_v61  ;;  %v1606_v2 = vmul.f32 %v1604_v63, %v1593_v29  ;;  %v1602_v6 = vmul.f32 0.5, %v1601_v5 }
 0x719   :  { %v1603_v1 = vmul.f32 %v1598_v62, %v1411_v44 }
 0x71b   :  { %v1607_v3 = vadd.f32 %v1606_v2, %v1603_v1 }
 0x71d   :  { %2101 = vtanh.f32 %v1607_v3 }
 0x727   :  { %v2102_v7 = vpop.eup %2101 }
 0x728   :  { %v1609_v8 = vmul.f32 %v2102_v7, %v1602_v6 }
 0x72a   :  { %1914 = vmatmul.mubr.msk.f32.vlgmr.msra.gmra.mrb[14].mxu0 %vm239_vm2, %v1609_v8  ;;  %1915 = vmatmul.mubr.msk.f32.vlgmr.msra.gmra.mrb[18].mxu1 %vm239_vm2, %v1609_v8 }
 0x72b   :  { %1930 = vmatprep.mubr.msk.f32.mxu0 %vm2161_vm3, %v2158_v0  ;;  %2063 = vmatpush3.bf16.msra.mxu0 %v2062_v16 }
 0x72c   :  { %2064 = vmatprep.subr.bf16.mxu0 %v2160_v14 }
 0x72f   :  { %2066 = vmatpush3.bf16.msra.mxu0 %v2065_v18 }
 0x7fd   :  { %v1681_v21 = vpop.f32.mrb[14].mxu0  ;;  %v1752_v22 = vpop.f32.mrb[18].mxu1 }
 0x7fe   :  { %v1683_v23 = vpop.f32.mrb[15].mxu0  ;;  %v1754_v25 = vpop.f32.mrb[19].mxu1 }
 0x7ff   :  { %v1761_v26 = vcombine.low %v1681_v21, %v1683_v23  ;;  %v1762_v27 = vcombine.low %v1752_v22, %v1754_v25 }
 0x801   :  { %v1769_v30 = vrot.slane %v1761_v26, %v2241_v52  ;;  %v1776_v31 = vrot.slane %v1762_v27, %v2241_v52 }
 0x803   :  { %v1777_v32 = vcombine.low %v1769_v30, %v1776_v31 }
 0x805   :  { %v1784_v33 = vrot.slane %v1777_v32, %v2241_v52  ;;  %v52_v52 = vld [vmem:[#allocation3 + $0x140] ss:$0 sm:$0xff] }
 0x807   :  { %v1786_v35 = vadd.f32 %v1784_v33, %v1611_v34 }
 0x809   :  { %2103 = vtanh.f32 %v1786_v35 }
 0x813   :  { %v2104_v0 = vpop.eup %2103 }
 0x814   :  { %v1788_v36 = vadd.f32 1.0, %v2104_v0  ;;  %v1791_v37 = vrot.slane %v2104_v0, 1  ;;  %v1800_v39 = vrot.slane %v2104_v0, 2  ;;  %v1795_v43 = vrot.slane %v2104_v0, 3 }
 0x816   :  { %v1789_v10 = vmul.f32 0.5, %v1788_v36  ;;  %v1793_v38 = vadd.f32 1.0, %v1791_v37  ;;  %v1797_v44 = vadd.f32 1.0, %v1795_v43 }
 0x818   :  { %v1794_v11 = vmul.f32 0.5, %v1793_v38  ;;  %v1802_v41 = vmul.f32 %v1800_v39, %v1789_v10  ;;  %v1798_v45 = vmul.f32 0.5, %v1797_v44 }
 0x81a   :  { %v1799_v40 = vmul.f32 %v1794_v11, %v1607_v3 }
 0x81c   :  { %v1803_v42 = vadd.f32 %v1802_v41, %v1799_v40 }
 0x81e   :  { %2105 = vtanh.f32 %v1803_v42 }
 0x828   :  { %v2106_v46 = vpop.eup %2105 }
 0x829   :  { %v1805_v47 = vmul.f32 %v2106_v46, %v1798_v45 }
 0x82b   :  { %1931 = vmatmul.mubr.msk.f32.vlgmr.msra.gmra.mrb[16].mxu0 %vm239_vm2, %v1805_v47 }
 0x8fe   :  { %v1875_v48 = vpop.f32.mrb[16].mxu0 }
 0x8ff   :  { %v1876_v49 = vadd.f32 %v1875_v48, %v52_v52  ;;  %v1932_v50 = vpop.f32.mrb[17].mxu0 }
 0x901   :  { %1880 = vst.msk [vmem:[#allocation6] sm:$0x1] %vm1879_vm4, %v1876_v49 }
 0x902   :  { %2140 = shalt.err (!%p2137_p12)
}
 0x903   :  { %s2141_s29 = scalar_lea.hbm %s2355_s2, 16 }
 0x904   :  { %p2142_p13 = scmp.ne.s32.totalorder %s2355_s2, %s2141_s29  ;;  %p2145_p0 = scmp.lt.u32.totalorder %s2141_s29, %s2355_s2 }
 0x906   :  { %p2147_p1 = pnand %p2145_p0, %p2142_p13 }
 0x908   :  { %2150 = shalt.err (!%p2147_p1)
}
 0x909   :  { %1890 = dma.vmem_to_hbm [thread:$0]  %s1888_s1, 16, %s2355_s2, [#allocation5]  }
 0x90a   :  { %2153 = dma.done.wait [#allocation5], 16  }
 0x90b   :  { %2154 = vsyncadd [#allocation5], 4294967280 }
 0x90c   :  { %1894 = vsyncpa [#allocation4], 1 }
 0x90d   :  { %1895 = vsyncpa [#allocation5], 1 }

</bundles_post_ra>
